<compile_context>
chip_gen: v7x
topology: tpu7x:2x2x1
jax: 0.10.0
libtpu: 0.0.40
codegen_flags: <defaults>
</compile_context>

<pallas_src>
import functools

import jax
import jax.numpy as jnp
from jax import lax
from jax.experimental import pallas as pl
from jax.experimental.pallas import tpu as pltpu


def _cross_attention_kernel(x_ref, y_ref, wq_ref, wkv_ref, wp_ref, bp_ref,
                            out_ref, attn_ref, q_scr, kv_scr, ctx_scr,
                            *, num_heads, head_dim):
    # x_ref:   (1, N, C)   y_ref: (1, M, C)
    # wq_ref:  (C, C)      -- Wq with the softmax scale folded in (resident)
    # wkv_ref: (C, 2C)     -- [Wk | Wv] packed (resident)
    # wp_ref:  (C, C)      -- output projection (resident)
    # bp_ref:  (1, C)
    # out_ref: (1, M, C)   attn_ref: (1, H, M, N)
    # q_scr:   (M, C)      kv_scr: (N, 2C)     ctx_scr: (M, C)
    dt = x_ref.dtype
    d = head_dim
    C = num_heads * d

    # --- Hoisted full-width projections (fill the MXU, once per batch elem) ---
    q_scr[...] = jnp.dot(y_ref[0], wq_ref[...],
                         preferred_element_type=jnp.float32).astype(dt)   # (M, C)
    kv_scr[...] = jnp.dot(x_ref[0], wkv_ref[...],
                          preferred_element_type=jnp.float32).astype(dt)  # (N, 2C)

    # --- Per-head attention (static unroll -> static lane slices only) ---
    for h in range(num_heads):
        q_h = q_scr[:, h * d:(h + 1) * d]              # (M, d), pre-scaled
        k_h = kv_scr[:, h * d:(h + 1) * d]             # (N, d)
        v_h = kv_scr[:, C + h * d:C + (h + 1) * d]     # (N, d)

        # Scores: contract the head dim directly (no explicit transpose).
        s = lax.dot_general(q_h, k_h, (((1,), (1,)), ((), ())),
                            preferred_element_type=jnp.float32)           # (M, N)

        # Numerically stable softmax in f32; exact divide so the returned
        # attention probabilities sum to 1.
        s = s - jnp.max(s, axis=-1, keepdims=True)
        e = jnp.exp(s)
        p = e / jnp.sum(e, axis=-1, keepdims=True)
        attn_ref[0, h] = p.astype(attn_ref.dtype)

        # Head-major context written at a static column offset.
        ctx_scr[:, h * d:(h + 1) * d] = jnp.dot(
            p.astype(dt), v_h, preferred_element_type=jnp.float32).astype(dt)

    # --- Deferred output projection: one full (M, C) @ (C, C) matmul + bias ---
    o = jnp.dot(ctx_scr[...], wp_ref[...], preferred_element_type=jnp.float32)
    out_ref[0] = (o + bp_ref[...].astype(jnp.float32)).astype(out_ref.dtype)


def cross_attention(x, y, wq, wk, wv, wproj, bproj, *, num_heads, qk_scale=None):
    B, N, C = x.shape
    _, M, _ = y.shape
    H = num_heads
    d = C // H
    scale = qk_scale if qk_scale is not None else d ** (-0.5)
    dt = x.dtype

    # Wrapper-side (free) layout plumbing: fold softmax scale into Wq, pack
    # Wk|Wv so the x projection is one wide MXU matmul.
    wq_s = (wq * scale).astype(dt)                       # (C, C)
    wkv = jnp.concatenate([wk, wv], axis=1).astype(dt)   # (C, 2C)
    wp = wproj.astype(dt)                                # (C, C)
    bp = bproj.reshape(1, C).astype(dt)                  # (1, C)

    kernel = functools.partial(_cross_attention_kernel, num_heads=H, head_dim=d)

    grid_spec = pltpu.PrefetchScalarGridSpec(
        num_scalar_prefetch=0,
        grid=(B,),
        in_specs=[
            pl.BlockSpec((1, N, C), lambda b: (b, 0, 0)),    # x (per-batch tile)
            pl.BlockSpec((1, M, C), lambda b: (b, 0, 0)),    # y (per-batch tile)
            pl.BlockSpec((C, C), lambda b: (0, 0)),          # Wq*scale (resident)
            pl.BlockSpec((C, 2 * C), lambda b: (0, 0)),      # [Wk|Wv]  (resident)
            pl.BlockSpec((C, C), lambda b: (0, 0)),          # Wproj    (resident)
            pl.BlockSpec((1, C), lambda b: (0, 0)),          # bias     (resident)
        ],
        out_specs=[
            pl.BlockSpec((1, M, C), lambda b: (b, 0, 0)),          # projected tokens
            pl.BlockSpec((1, H, M, N), lambda b: (b, 0, 0, 0)),    # attention probs
        ],
        scratch_shapes=[
            pltpu.VMEM((M, C), dt),        # Q (scaled)
            pltpu.VMEM((N, 2 * C), dt),    # K | V
            pltpu.VMEM((M, C), dt),        # head-major context
        ],
    )

    itemsize = jnp.dtype(dt).itemsize
    flops = (2 * B * M * C * C            # Q projection
             + 2 * B * N * C * (2 * C)    # K|V projection
             + 2 * B * M * N * C          # scores, all heads
             + 2 * B * M * N * C          # probs @ V, all heads
             + 2 * B * M * C * C)         # output projection
    bytes_accessed = itemsize * (x.size + y.size + wq_s.size + wkv.size
                                 + wp.size + bp.size
                                 + B * M * C + B * H * M * N)
    cost = pl.CostEstimate(flops=flops,
                           transcendentals=B * H * M * N,
                           bytes_accessed=bytes_accessed)

    out_shape = (
        jax.ShapeDtypeStruct((B, M, C), dt),
        jax.ShapeDtypeStruct((B, H, M, N), dt),
    )

    return pl.pallas_call(
        kernel,
        grid_spec=grid_spec,
        out_shape=out_shape,
        compiler_params=pltpu.CompilerParams(
            dimension_semantics=("parallel",)),
        cost_estimate=cost,
    )(x, y, wq_s, wkv, wp, bp)


def _reference(x, y, wq, wk, wv, wproj, bproj, *, num_heads):
    B, N, C = x.shape
    _, M, _ = y.shape
    hd = C // num_heads
    scale = hd ** (-0.5)
    q = (y @ wq).reshape(B, M, num_heads, hd).transpose(0, 2, 1, 3)
    k = (x @ wk).reshape(B, N, num_heads, hd).transpose(0, 2, 1, 3)
    v = (x @ wv).reshape(B, N, num_heads, hd).transpose(0, 2, 1, 3)
    attn = jax.nn.softmax(jnp.einsum('bhmd,bhnd->bhmn', q, k) * scale, axis=-1)
    o = jnp.einsum('bhmn,bhnd->bhmd', attn, v).transpose(0, 2, 1, 3).reshape(B, M, C)
    return o @ wproj + bproj, attn


if __name__ == "__main__":
    # Small shapes consistent with the module's forward.
    B, N, M, C, H = 2, 16, 8, 32, 2

    key = jax.random.PRNGKey(0)
    kx, ky, k1, k2, k3, k4, k5 = jax.random.split(key, 7)

    x = jax.random.normal(kx, (B, N, C), dtype=jnp.float32)
    y = jax.random.normal(ky, (B, M, C), dtype=jnp.float32)

    # Deterministic parameter init (synthetic; stored as (in, out)).
    s = 1.0 / (C ** 0.5)
    wq = jax.random.uniform(k1, (C, C), jnp.float32, -s, s)
    wk = jax.random.uniform(k2, (C, C), jnp.float32, -s, s)
    wv = jax.random.uniform(k3, (C, C), jnp.float32, -s, s)
    wproj = jax.random.uniform(k4, (C, C), jnp.float32, -s, s)
    bproj = jax.random.uniform(k5, (C,), jnp.float32, -s, s)

    out, attn = cross_attention(x, y, wq, wk, wv, wproj, bproj, num_heads=H)
    jax.block_until_ready((out, attn))

    ref_out, ref_attn = _reference(x, y, wq, wk, wv, wproj, bproj, num_heads=H)
    assert out.shape == (B, M, C) and attn.shape == (B, H, M, N)
    # Tolerance governed by MXU f32 (multi-pass bf16) matmul accumulation order.
    assert jnp.allclose(out, ref_out, atol=1e-2, rtol=1e-2)
    assert jnp.allclose(attn, ref_attn, atol=1e-2, rtol=1e-2)

    print("KERNEL_OK")
</pallas_src>

<mosaic_0001>
module attributes {stable_mosaic.version = 11 : i64} {
  func.func @_cross_attention_kernel(%arg0: i32, %arg1: memref<1x16x32xf32, #tpu.memory_space<vmem>>, %arg2: memref<1x8x32xf32, #tpu.memory_space<vmem>>, %arg3: memref<32x32xf32, #tpu.memory_space<vmem>>, %arg4: memref<32x64xf32, #tpu.memory_space<vmem>>, %arg5: memref<32x32xf32, #tpu.memory_space<vmem>>, %arg6: memref<1x32xf32, #tpu.memory_space<vmem>>, %arg7: memref<1x8x32xf32, #tpu.memory_space<vmem>>, %arg8: memref<1x2x8x16xf32, #tpu.memory_space<vmem>>, %arg9: memref<8x32xf32, #tpu.memory_space<vmem>>, %arg10: memref<16x64xf32, #tpu.memory_space<vmem>>, %arg11: memref<8x32xf32, #tpu.memory_space<vmem>>) attributes {dimension_semantics = [#tpu.dimension_semantics<parallel>], iteration_bounds = array<i64: 2>, scalar_prefetch = 0 : i64, scratch_operands = 3 : i64, tpu.core_type = #tpu.core_type<tc>, window_params = [{transform_indices = @transform_0, window_bounds = array<i64: 1, 16, 32>}, {transform_indices = @transform_1, window_bounds = array<i64: 1, 8, 32>}, {pipeline_mode = #tpu.pipeline_mode<synchronous>, transform_indices = @transform_2, window_bounds = array<i64: 32, 32>}, {pipeline_mode = #tpu.pipeline_mode<synchronous>, transform_indices = @transform_3, window_bounds = array<i64: 32, 64>}, {pipeline_mode = #tpu.pipeline_mode<synchronous>, transform_indices = @transform_4, window_bounds = array<i64: 32, 32>}, {pipeline_mode = #tpu.pipeline_mode<synchronous>, transform_indices = @transform_5, window_bounds = array<i64: 1, 32>}, {transform_indices = @transform_6, window_bounds = array<i64: 1, 8, 32>}, {transform_indices = @transform_7, window_bounds = array<i64: 1, 2, 8, 16>}]} {
    %c0 = arith.constant 0 : index
    %c0_0 = arith.constant 0 : index
    %c0_1 = arith.constant 0 : index
    %0 = vector.load %arg2[%c0, %c0_0, %c0_1] : memref<1x8x32xf32, #tpu.memory_space<vmem>>, vector<1x8x32xf32>
    %1 = vector.shape_cast %0 : vector<1x8x32xf32> to vector<8x32xf32>
    %c0_2 = arith.constant 0 : index
    %c0_3 = arith.constant 0 : index
    %2 = vector.load %arg3[%c0_2, %c0_3] : memref<32x32xf32, #tpu.memory_space<vmem>>, vector<32x32xf32>
    %cst = arith.constant dense<0.000000e+00> : vector<8x32xf32>
    %3 = tpu.matmul %1, %2, %cst {dimension_numbers = #tpu.dot_dimension_numbers<[1], [0], [0], [1], [0, 0, 1, 1], [], []>} : vector<8x32xf32>, vector<32x32xf32>, vector<8x32xf32> -> vector<8x32xf32>
    %c0_4 = arith.constant 0 : index
    %c0_5 = arith.constant 0 : index
    %4 = vector.load %arg9[%c0_4, %c0_5] : memref<8x32xf32, #tpu.memory_space<vmem>>, vector<8x32xf32>
    tpu.vector_store %arg9[%c0_4, %c0_5], %3 {strides = array<i32>} : memref<8x32xf32, #tpu.memory_space<vmem>>, vector<8x32xf32>,
    %c0_6 = arith.constant 0 : index
    %c0_7 = arith.constant 0 : index
    %c0_8 = arith.constant 0 : index
    %5 = vector.load %arg1[%c0_6, %c0_7, %c0_8] : memref<1x16x32xf32, #tpu.memory_space<vmem>>, vector<1x16x32xf32>
    %6 = vector.shape_cast %5 : vector<1x16x32xf32> to vector<16x32xf32>
    %c0_9 = arith.constant 0 : index
    %c0_10 = arith.constant 0 : index
    %7 = vector.load %arg4[%c0_9, %c0_10] : memref<32x64xf32, #tpu.memory_space<vmem>>, vector<32x64xf32>
    %cst_11 = arith.constant dense<0.000000e+00> : vector<16x64xf32>
    %8 = tpu.matmul %6, %7, %cst_11 {dimension_numbers = #tpu.dot_dimension_numbers<[1], [0], [0], [1], [0, 0, 1, 1], [], []>} : vector<16x32xf32>, vector<32x64xf32>, vector<16x64xf32> -> vector<16x64xf32>
    %c0_12 = arith.constant 0 : index
    %c0_13 = arith.constant 0 : index
    %9 = vector.load %arg10[%c0_12, %c0_13] : memref<16x64xf32, #tpu.memory_space<vmem>>, vector<16x64xf32>
    tpu.vector_store %arg10[%c0_12, %c0_13], %8 {strides = array<i32>} : memref<16x64xf32, #tpu.memory_space<vmem>>, vector<16x64xf32>,
    %c0_14 = arith.constant 0 : index
    %c0_15 = arith.constant 0 : index
    %10 = vector.load %arg9[%c0_14, %c0_15] : memref<8x32xf32, #tpu.memory_space<vmem>>, vector<8x16xf32>
    %c0_16 = arith.constant 0 : index
    %c0_17 = arith.constant 0 : index
    %11 = vector.load %arg10[%c0_16, %c0_17] : memref<16x64xf32, #tpu.memory_space<vmem>>, vector<16x16xf32>
    %c0_18 = arith.constant 0 : index
    %c32 = arith.constant 32 : index
    %12 = vector.load %arg10[%c0_18, %c32] : memref<16x64xf32, #tpu.memory_space<vmem>>, vector<16x16xf32>
    %cst_19 = arith.constant dense<0.000000e+00> : vector<8x16xf32>
    %13 = tpu.matmul %10, %11, %cst_19 {dimension_numbers = #tpu.dot_dimension_numbers<[1], [1], [0], [0], [0, 0, 1, 0], [], []>} : vector<8x16xf32>, vector<16x16xf32>, vector<8x16xf32> -> vector<8x16xf32>
    %cst_20 = arith.constant dense<0xFF800000> : vector<8xf32>
    %14 = vector.multi_reduction <maximumf>, %13, %cst_20 [1] : vector<8x16xf32> to vector<8xf32>
    %15 = vector.shape_cast %14 : vector<8xf32> to vector<8x1xf32>
    %16 = vector.broadcast %15 : vector<8x1xf32> to vector<8x16xf32>
    %17 = arith.subf %13, %16 : vector<8x16xf32>
    %18 = math.exp %17 : vector<8x16xf32>
    %cst_21 = arith.constant dense<0.000000e+00> : vector<8xf32>
    %19 = vector.multi_reduction <add>, %18, %cst_21 [1] : vector<8x16xf32> to vector<8xf32>
    %20 = vector.shape_cast %19 : vector<8xf32> to vector<8x1xf32>
    %21 = vector.broadcast %20 : vector<8x1xf32> to vector<8x16xf32>
    %22 = arith.divf %18, %21 : vector<8x16xf32>
    %c0_22 = arith.constant 0 : index
    %c0_23 = arith.constant 0 : index
    %c0_24 = arith.constant 0 : index
    %c0_25 = arith.constant 0 : index
    %23 = vector.load %arg8[%c0_22, %c0_23, %c0_24, %c0_25] : memref<1x2x8x16xf32, #tpu.memory_space<vmem>>, vector<1x1x8x16xf32>
    %24 = vector.shape_cast %23 : vector<1x1x8x16xf32> to vector<8x16xf32>
    %25 = vector.shape_cast %22 : vector<8x16xf32> to vector<1x1x8x16xf32>
    tpu.vector_store %arg8[%c0_22, %c0_23, %c0_24, %c0_25], %25 {strides = array<i32>} : memref<1x2x8x16xf32, #tpu.memory_space<vmem>>, vector<1x1x8x16xf32>,
    %cst_26 = arith.constant dense<0.000000e+00> : vector<8x16xf32>
    %26 = tpu.matmul %22, %12, %cst_26 {dimension_numbers = #tpu.dot_dimension_numbers<[1], [0], [0], [1], [0, 0, 1, 1], [], []>} : vector<8x16xf32>, vector<16x16xf32>, vector<8x16xf32> -> vector<8x16xf32>
    %c0_27 = arith.constant 0 : index
    %c0_28 = arith.constant 0 : index
    %27 = vector.load %arg11[%c0_27, %c0_28] : memref<8x32xf32, #tpu.memory_space<vmem>>, vector<8x16xf32>
    tpu.vector_store %arg11[%c0_27, %c0_28], %26 {strides = array<i32>} : memref<8x32xf32, #tpu.memory_space<vmem>>, vector<8x16xf32>,
    %c0_29 = arith.constant 0 : index
    %c16 = arith.constant 16 : index
    %28 = vector.load %arg9[%c0_29, %c16] : memref<8x32xf32, #tpu.memory_space<vmem>>, vector<8x16xf32>
    %c0_30 = arith.constant 0 : index
    %c16_31 = arith.constant 16 : index
    %29 = vector.load %arg10[%c0_30, %c16_31] : memref<16x64xf32, #tpu.memory_space<vmem>>, vector<16x16xf32>
    %c0_32 = arith.constant 0 : index
    %c48 = arith.constant 48 : index
    %30 = vector.load %arg10[%c0_32, %c48] : memref<16x64xf32, #tpu.memory_space<vmem>>, vector<16x16xf32>
    %cst_33 = arith.constant dense<0.000000e+00> : vector<8x16xf32>
    %31 = tpu.matmul %28, %29, %cst_33 {dimension_numbers = #tpu.dot_dimension_numbers<[1], [1], [0], [0], [0, 0, 1, 0], [], []>} : vector<8x16xf32>, vector<16x16xf32>, vector<8x16xf32> -> vector<8x16xf32>
    %cst_34 = arith.constant dense<0xFF800000> : vector<8xf32>
    %32 = vector.multi_reduction <maximumf>, %31, %cst_34 [1] : vector<8x16xf32> to vector<8xf32>
    %33 = vector.shape_cast %32 : vector<8xf32> to vector<8x1xf32>
    %34 = vector.broadcast %33 : vector<8x1xf32> to vector<8x16xf32>
    %35 = arith.subf %31, %34 : vector<8x16xf32>
    %36 = math.exp %35 : vector<8x16xf32>
    %cst_35 = arith.constant dense<0.000000e+00> : vector<8xf32>
    %37 = vector.multi_reduction <add>, %36, %cst_35 [1] : vector<8x16xf32> to vector<8xf32>
    %38 = vector.shape_cast %37 : vector<8xf32> to vector<8x1xf32>
    %39 = vector.broadcast %38 : vector<8x1xf32> to vector<8x16xf32>
    %40 = arith.divf %36, %39 : vector<8x16xf32>
    %c0_36 = arith.constant 0 : index
    %c1 = arith.constant 1 : index
    %c0_37 = arith.constant 0 : index
    %c0_38 = arith.constant 0 : index
    %41 = vector.load %arg8[%c0_36, %c1, %c0_37, %c0_38] : memref<1x2x8x16xf32, #tpu.memory_space<vmem>>, vector<1x1x8x16xf32>
    %42 = vector.shape_cast %41 : vector<1x1x8x16xf32> to vector<8x16xf32>
    %43 = vector.shape_cast %40 : vector<8x16xf32> to vector<1x1x8x16xf32>
    tpu.vector_store %arg8[%c0_36, %c1, %c0_37, %c0_38], %43 {strides = array<i32>} : memref<1x2x8x16xf32, #tpu.memory_space<vmem>>, vector<1x1x8x16xf32>,
    %cst_39 = arith.constant dense<0.000000e+00> : vector<8x16xf32>
    %44 = tpu.matmul %40, %30, %cst_39 {dimension_numbers = #tpu.dot_dimension_numbers<[1], [0], [0], [1], [0, 0, 1, 1], [], []>} : vector<8x16xf32>, vector<16x16xf32>, vector<8x16xf32> -> vector<8x16xf32>
    %c0_40 = arith.constant 0 : index
    %c16_41 = arith.constant 16 : index
    %45 = vector.load %arg11[%c0_40, %c16_41] : memref<8x32xf32, #tpu.memory_space<vmem>>, vector<8x16xf32>
    tpu.vector_store %arg11[%c0_40, %c16_41], %44 {strides = array<i32>} : memref<8x32xf32, #tpu.memory_space<vmem>>, vector<8x16xf32>,
    %c0_42 = arith.constant 0 : index
    %c0_43 = arith.constant 0 : index
    %46 = vector.load %arg11[%c0_42, %c0_43] : memref<8x32xf32, #tpu.memory_space<vmem>>, vector<8x32xf32>
    %c0_44 = arith.constant 0 : index
    %c0_45 = arith.constant 0 : index
    %47 = vector.load %arg5[%c0_44, %c0_45] : memref<32x32xf32, #tpu.memory_space<vmem>>, vector<32x32xf32>
    %cst_46 = arith.constant dense<0.000000e+00> : vector<8x32xf32>
    %48 = tpu.matmul %46, %47, %cst_46 {dimension_numbers = #tpu.dot_dimension_numbers<[1], [0], [0], [1], [0, 0, 1, 1], [], []>} : vector<8x32xf32>, vector<32x32xf32>, vector<8x32xf32> -> vector<8x32xf32>
    %c0_47 = arith.constant 0 : index
    %c0_48 = arith.constant 0 : index
    %49 = vector.load %arg6[%c0_47, %c0_48] : memref<1x32xf32, #tpu.memory_space<vmem>>, vector<1x32xf32>
    %50 = vector.broadcast %49 : vector<1x32xf32> to vector<8x32xf32>
    %51 = arith.addf %48, %50 : vector<8x32xf32>
    %c0_49 = arith.constant 0 : index
    %c0_50 = arith.constant 0 : index
    %c0_51 = arith.constant 0 : index
    %52 = vector.load %arg7[%c0_49, %c0_50, %c0_51] : memref<1x8x32xf32, #tpu.memory_space<vmem>>, vector<1x8x32xf32>
    %53 = vector.shape_cast %52 : vector<1x8x32xf32> to vector<8x32xf32>
    %54 = vector.shape_cast %51 : vector<8x32xf32> to vector<1x8x32xf32>
    tpu.vector_store %arg7[%c0_49, %c0_50, %c0_51], %54 {strides = array<i32>} : memref<1x8x32xf32, #tpu.memory_space<vmem>>, vector<1x8x32xf32>,
    return
  }
  func.func @transform_0(%arg0: i32) -> (i32, i32, i32) {
    %c0_i32 = arith.constant 0 : i32
    %c0_i32_0 = arith.constant 0 : i32
    %c0_i32_1 = arith.constant 0 : i32
    return %arg0, %c0_i32, %c0_i32_0 : i32, i32, i32
  }
  func.func @transform_1(%arg0: i32) -> (i32, i32, i32) {
    %c0_i32 = arith.constant 0 : i32
    %c0_i32_0 = arith.constant 0 : i32
    %c0_i32_1 = arith.constant 0 : i32
    return %arg0, %c0_i32, %c0_i32_0 : i32, i32, i32
  }
  func.func @transform_2(%arg0: i32) -> (i32, i32) {
    %c0_i32 = arith.constant 0 : i32
    %c0_i32_0 = arith.constant 0 : i32
    %c0_i32_1 = arith.constant 0 : i32
    return %c0_i32, %c0_i32_0 : i32, i32
  }
  func.func @transform_3(%arg0: i32) -> (i32, i32) {
    %c0_i32 = arith.constant 0 : i32
    %c0_i32_0 = arith.constant 0 : i32
    %c0_i32_1 = arith.constant 0 : i32
    return %c0_i32, %c0_i32_0 : i32, i32
  }
  func.func @transform_4(%arg0: i32) -> (i32, i32) {
    %c0_i32 = arith.constant 0 : i32
    %c0_i32_0 = arith.constant 0 : i32
    %c0_i32_1 = arith.constant 0 : i32
    return %c0_i32, %c0_i32_0 : i32, i32
  }
  func.func @transform_5(%arg0: i32) -> (i32, i32) {
    %c0_i32 = arith.constant 0 : i32
    %c0_i32_0 = arith.constant 0 : i32
    %c0_i32_1 = arith.constant 0 : i32
    return %c0_i32, %c0_i32_0 : i32, i32
  }
  func.func @transform_6(%arg0: i32) -> (i32, i32, i32) {
    %c0_i32 = arith.constant 0 : i32
    %c0_i32_0 = arith.constant 0 : i32
    %c0_i32_1 = arith.constant 0 : i32
    return %arg0, %c0_i32, %c0_i32_0 : i32, i32, i32
  }
  func.func @transform_7(%arg0: i32) -> (i32, i32, i32, i32) {
    %c0_i32 = arith.constant 0 : i32
    %c0_i32_0 = arith.constant 0 : i32
    %c0_i32_1 = arith.constant 0 : i32
    %c0_i32_2 = arith.constant 0 : i32
    return %arg0, %c0_i32, %c0_i32_0, %c0_i32_1 : i32, i32, i32, i32
  }
}

</mosaic_0001>

<bundles_post_ra>
// kernel: tpu_custom_call.1
= control target key start
LH: loop header
LB: loop body
LE: loop exit
PB: predicated region body
PF: predicated region fallthrough
CT: control target
= control target key end

     0   :  { %s2202_s0 = inlined_call_operand.hbm [shape: f32[2,16,32], index: 0, kind: input, shape index: {}]   ;;  %s2203_s1 = inlined_call_operand.hbm [shape: f32[2,8,32], index: 1, kind: input, shape index: {}]   ;;  %s2204_s2 = inlined_call_operand.hbm [shape: f32[32,32], index: 2, kind: input, shape index: {}]   ;;  %s2205_s3 = inlined_call_operand.hbm [shape: f32[32,64], index: 3, kind: input, shape index: {}]   ;;  %s2206_s4 = inlined_call_operand.hbm [shape: f32[32,32], index: 4, kind: input, shape index: {}]   ;;  %s2207_s5 = inlined_call_operand.vmem [shape: f32[1,32], index: 5, kind: input, shape index: {}]   ;;  %s2208_s6 = inlined_call_operand.hbm [shape: f32[2,8,32], index: 6, kind: output, shape index: {0}]   ;;  %s2209_s7 = inlined_call_operand.hbm [shape: f32[2,2,8,16], index: 7, kind: output, shape index: {1}]  }
   0x1   :  { %2216 = sst [smem:[#allocation24_spill]] %s2202_s0 }
   0x2   :  { %2217 = sst [smem:[#allocation25_spill]] %s2204_s2 }
   0x3   :  { %2218 = sst [smem:[#allocation26_spill]] %s2205_s3 }
   0x4   :  { %2219 = sst [smem:[#allocation27_spill]] %s2206_s4 }
   0x5   :  { %13 = vsyncpa [#allocation6], 0 }
   0x6   :  { %15 = vsyncpa [#allocation6 + $0x1], 0 }
   0x7   :  { %16 = vsyncpa [#allocation9], 0 }
   0x8   :  { %18 = vsyncpa [#allocation9 + $0x1], 0 }
   0x9   :  { %19 = vsyncpa [#allocation12], 0 }
   0xa   :  { %20 = vsyncpa [#allocation7], 0 }
   0xb   :  { %22 = vsyncpa [#allocation7 + $0x1], 0 }
   0xc   :  { %23 = vsyncpa [#allocation16], 0 }
   0xd   :  { %25 = vsyncpa [#allocation16 + $0x1], 0  ;;  %s1793_s24 = smov 0   ;;  %s1795_s25 = smov 0  }
   0xe   :  { %s1797_s26 = smov 0   ;;  %s1799_s27 = smov 0  }
   0xf LB: > { %s1814_s28 = sadd.s32 4294967295, %s1733_s27   ;;  %s1193_s29 = sadd.s32 4294967294, %s1733_s27   ;;  %s1733_s27 = sphi %s1799_s27, %s2250_s27   ;;  %s1729_s26 = sphi %s1797_s26, %s2249_s26   ;;  %s1725_s25 = sphi %s1795_s25, %s2248_s25   ;;  %s1721_s24 = sphi %s1793_s24, %s2247_s24  }
  0x10   : > { %p51_p0 = scmp.ne.s32.totalorder %s1725_s25, %s1721_s24  ;;  %p2210_p1 = scmp.eq.s32.totalorder %s1814_s28, 0 }
  0x11   : > { %p191_p3 = scmp.eq.s32.totalorder %s1193_s29, 1  ;;  %p1194_p5 = scmp.ge.s32.totalorder %s1733_s27, 1 }
  0x12   : > { %p1823_p4 = por %p2210_p1, %p51_p0  ;;  %p224_p7 = scmp.lt.s32.totalorder %s1733_s27, 3 }
  0x13   : > { %p1828_p6 = por %p191_p3, %p51_p0  ;;  %s1735_s10 = smov [#allocation10]  }
  0x14   : > { %s2220_s30 = scalar_select %p1823_p4, 1, 0 }
  0x15   : > { %s2221_s8 = scalar_select %p1828_p6, 1, 0 }
  0x16   : > { %p1833_p8 = pnand %p1194_p5, %p224_p7  ;;  %s236_s11 = sshll.u32 %s1735_s10, 4  ;;  %s1837_s11 = int_to_ptr.vmem [resolvable:$true] %s236_s11 }
  0x17   : > { %2222 = sst [smem:[#allocation23_spill]] %s2221_s8  ;;  %s1736_s13 = smov [#allocation11]  }
  0x18   : > { %s2223_s9 = scalar_select %p1833_p8, 1, 0 }
  0x19   : > { %p1378_p9 = pneg %p1833_p8  ;;  %s249_s14 = sshll.u32 %s1736_s13, 4  ;;  %s1848_s14 = int_to_ptr.vmem [resolvable:$true] %s249_s14 }
  0x1a   : > { %s1737_s15 = smov [#allocation13]   ;;  %s2225_s2 = sld [smem:[#allocation25_spill]] }
  0x1b   : > { %p1844_p11 = pnand %p1378_p9, %p2210_p1  ;;  %s1850_s16 = sshll.u32 %s1737_s15, 4  ;;  %s263_s16 = int_to_ptr.vmem [resolvable:$true] %s1850_s16 }
  0x1d   : > { %p1860_p13 = pneg %p1844_p11 }
  0x20   : > { %s1479_s19 = scalar_lea.hbm %s2225_s2, 512 }
  0x21   : > { %p1480_p12 = scmp.ne.s32.totalorder %s2225_s2, %s1479_s19  ;;  %p1486_p5 = scmp.lt.u32.totalorder %s1479_s19, %s2225_s2 }
  0x23   : > { %p1482_p0 = pnand %p1860_p13, %p1480_p12 }
  0x25   : > { %p1483_p3 = pneg %p1482_p0 }
  0x27   : > { %p1488_p7 = pnand %p1486_p5, %p1483_p3 }
  0x29   : > { %1491 = shalt.err (!%p1488_p7)
}
  0x2a   : > { %s1492_s10 = scalar_lea.vmem %s1837_s11, 512  ;;  %p1500_p2 = scmp.lt.s32.totalorder %s1837_s11, %s1837_s11 }
  0x2b   : > { %p1493_p9 = scmp.ne.s32.totalorder %s1837_s11, %s1492_s10  ;;  %p1501_p6 = scmp.lt.s32.totalorder %s1492_s10, %s1492_s10 }
  0x2d   : > { %p1495_p10 = pnand %p1493_p9, %p1860_p13  ;;  %p1502_p12 = por %p1501_p6, %p1500_p2 }
  0x2f   : > { %p1496_p1 = pneg %p1495_p10 }
  0x31   : > { %p1503_p0 = pnand %p1502_p12, %p1496_p1 }
  0x33   : > { %1506 = shalt.err (!%p1503_p0)
}
  0x34   : > { %s2214_s13 = smov 128   ;;  %s1739_s15 = smov 8  }
  0x35   : > { %1381 = dma.hbm_to_vmem [thread:$0]  (!%p1844_p11), %s2225_s2, 512, %s1837_s11, [#allocation9], %s2214_s13, %s2214_s13, %s1739_s15  }
  0x36   : > { %s2227_s3 = sld [smem:[#allocation26_spill]] }
  0x3c   : > { %s1507_s21 = scalar_lea.hbm %s2227_s3, 512 }
  0x3d   : > { %p1508_p1 = scmp.ne.s32.totalorder %s2227_s3, %s1507_s21  ;;  %p1514_p10 = scmp.lt.u32.totalorder %s1507_s21, %s2227_s3 }
  0x3f   : > { %p1510_p2 = pnand %p1508_p1, %p1860_p13 }
  0x41   : > { %p1511_p6 = pneg %p1510_p2 }
  0x43   : > { %p1516_p3 = pnand %p1514_p10, %p1511_p6 }
  0x45   : > { %1519 = shalt.err (!%p1516_p3)
}
  0x46   : > { %s1520_s11 = scalar_lea.vmem %s1848_s14, 512  ;;  %p1528_p12 = scmp.lt.s32.totalorder %s1848_s14, %s1848_s14 }
  0x47   : > { %p1521_p5 = scmp.ne.s32.totalorder %s1848_s14, %s1520_s11  ;;  %p1529_p0 = scmp.lt.s32.totalorder %s1520_s11, %s1520_s11 }
  0x49   : > { %p1523_p7 = pnand %p1521_p5, %p1860_p13  ;;  %p1530_p1 = por %p1529_p0, %p1528_p12 }
  0x4b   : > { %p1524_p9 = pneg %p1523_p7 }
  0x4d   : > { %p1531_p2 = pnand %p1530_p1, %p1524_p9 }
  0x4f   : > { %1534 = shalt.err (!%p1531_p2)
}
  0x50   : > { %1384 = dma.hbm_to_vmem [thread:$0]  (!%p1844_p11), %s2227_s3, 512, %s1848_s14, [#allocation12], %s2214_s13, %s2214_s13, %s1739_s15  }
  0x51   : > { %s2228_s4 = sld [smem:[#allocation27_spill]] }
  0x57   : > { %s1535_s20 = scalar_lea.hbm %s2228_s4, 512 }
  0x58   : > { %p1536_p6 = scmp.ne.s32.totalorder %s2228_s4, %s1535_s20  ;;  %p1542_p5 = scmp.lt.u32.totalorder %s1535_s20, %s2228_s4 }
  0x5a   : > { %p1538_p10 = pnand %p1536_p6, %p1860_p13 }
  0x5c   : > { %p1539_p3 = pneg %p1538_p10 }
  0x5e   : > { %p1544_p7 = pnand %p1542_p5, %p1539_p3 }
  0x60   : > { %1547 = shalt.err (!%p1544_p7)
}
  0x61   : > { %s1548_s11 = scalar_lea.vmem %s263_s16, 512  ;;  %p1556_p1 = scmp.lt.s32.totalorder %s263_s16, %s263_s16 }
  0x62   : > { %p1549_p9 = scmp.ne.s32.totalorder %s263_s16, %s1548_s11  ;;  %p1557_p2 = scmp.lt.s32.totalorder %s1548_s11, %s1548_s11 }
  0x64   : > { %p1551_p12 = pnand %p1549_p9, %p1860_p13  ;;  %p1558_p4 = por %p1557_p2, %p1556_p1 }
  0x66   : > { %p1552_p0 = pneg %p1551_p12 }
  0x68   : > { %p1559_p8 = pnand %p1558_p4, %p1552_p0 }
  0x6a   : > { %1562 = shalt.err (!%p1559_p8)
}
  0x6b   : > { %1387 = dma.hbm_to_vmem [thread:$0]  (!%p1844_p11), %s2228_s4, 512, %s263_s16, [#allocation12], %s2214_s13, %s2214_s13, %s1739_s15  }
  0x6c   : > { %s1933_s22 = sadd.s32 1, %s1733_s27   ;;  %s38_s17 = sadd.s32 1, %s1729_s26 }
  0x6d   : > { %s35_s12 = ssub.s32 %s1733_s27, %s1933_s22  ;;  %p45_p8 = scmp.ne.s32.totalorder %s1729_s26, %s1725_s25 }
  0x6e   : > { %p36_p4 = scmp.eq.s32.totalorder %s35_s12, 0  ;;  %p46_p13 = scmp.eq.s32.totalorder %s1733_s27, 0 }
  0x6f   : > { %p1405_p6 = scmp.lt.s32.totalorder %s1733_s27, 2  ;;  %p2229_p3 = scmp.eq.s32.totalorder %s1814_s28, 1 }
  0x70   : > { %s1943_s18 = scalar_select %p36_p4, %s1729_s26, %s38_s17  }
  0x71   : > { %p47_p10 = por %p46_p13, %p45_p8  ;;  %p1947_p5 = por %p2229_p3, %p45_p8 }
  0x72   : > { %s1952_s20 = sand.u32 1, %s1729_s26   ;;  %s1233_s16 = sshll.u32 %s1733_s27, 8 }
  0x73   : > { %s2230_s19 = scalar_select %p1947_p5, 1, 0 }
  0x74   : > { %s1199_s21 = sshll.u32 %s1952_s20, 4  ;;  %s2231_s0 = sld [smem:[#allocation24_spill]] }
  0x75   : > { %s283_s11 = scalar_lea.vmem [#allocation5], %s1199_s21  ;;  %p1961_p11 = pnand %p1405_p6, %p47_p10 }
  0x76   : > { %s290_s14 = sshll.u32 %s283_s11, 4  ;;  %s280_s17 = scalar_lea.sflag [#allocation6], %s1952_s20  ;;  %s1965_s14 = int_to_ptr.vmem [resolvable:$true] %s290_s14 }
  0x77   : > { %p1565_p9 = pneg %p1961_p11 }
  0x7a   : > { %s1959_s10 = scalar_lea.hbm %s2231_s0, %s1233_s16  ;;  %s1568_s23 = scalar_lea.hbm %s2231_s0, 512 }
  0x7b   : > { %s1563_s13 = scalar_lea.hbm %s1959_s10, 256  ;;  %p1569_p1 = scmp.lt.u32.totalorder %s1959_s10, %s2231_s0 }
  0x7c   : > { %p1564_p7 = scmp.ne.s32.totalorder %s1959_s10, %s1563_s13  ;;  %p1570_p2 = scmp.lt.u32.totalorder %s1568_s23, %s1563_s13 }
  0x7d   : > { %p1572_p8 = scmp.lt.u32.totalorder %s1563_s13, %s1959_s10 }
  0x7e   : > { %p1566_p12 = pnand %p1565_p9, %p1564_p7  ;;  %p1571_p4 = por %p1570_p2, %p1569_p1 }
  0x80   : > { %p1567_p0 = pneg %p1566_p12  ;;  %p1573_p13 = por %p1572_p8, %p1571_p4 }
  0x82   : > { %p1574_p6 = pnand %p1573_p13, %p1567_p0 }
  0x84   : > { %1577 = shalt.err (!%p1574_p6)
}
  0x85   : > { %s1578_s12 = scalar_lea.vmem %s1965_s14, 256  ;;  %s1740_s16 = smov [#allocation5]  }
  0x86   : > { %p1579_p10 = scmp.ne.s32.totalorder %s1965_s14, %s1578_s12  ;;  %s1583_s21 = sshll.u32 %s1740_s16, 4  ;;  %s1584_s21 = int_to_ptr.vmem [resolvable:$false] %s1583_s21 }
  0x87   : > { %s1585_s29 = scalar_lea.vmem %s1584_s21, 512  ;;  %p1586_p12 = scmp.lt.s32.totalorder %s1965_s14, %s1584_s21 }
  0x88   : > { %p1581_p3 = pnand %p1579_p10, %p1565_p9  ;;  %p1587_p1 = scmp.lt.s32.totalorder %s1585_s29, %s1578_s12 }
  0x8a   : > { %p1582_p7 = pneg %p1581_p3  ;;  %p1588_p2 = por %p1587_p1, %p1586_p12 }
  0x8c   : > { %p1589_p4 = pnand %p1588_p2, %p1582_p7 }
  0x8e   : > { %1592 = shalt.err (!%p1589_p4)
}
  0x8f   : > { %s2233_s13 = smov 128   ;;  %s1202_s23 = sshll.u32 %s1952_s20, 3 }
  0x90   : > { %1391 = dma.hbm_to_vmem [thread:$0]  (!%p1961_p11), %s1959_s10, 256, %s1965_s14, %s280_s17, %s2233_s13, %s2233_s13, %s1739_s15  }
  0x91   : > { %s1203_s11 = sshll.u32 %s1733_s27, 7  ;;  %s304_s29 = scalar_lea.vmem [#allocation8], %s1202_s23 }
  0x92   : > { %s2004_s21 = scalar_lea.hbm %s2203_s1, %s1203_s11  ;;  %s311_s0 = sshll.u32 %s304_s29, 4  ;;  %s312_s0 = int_to_ptr.vmem [resolvable:$true] %s311_s0 }
  0x93   : > { %s2234_s2 = sand.u32 1, %s1733_s27   ;;  %s1593_s4 = scalar_lea.hbm %s2004_s21, 128 }
  0x94   : > { %s301_s3 = scalar_lea.sflag [#allocation9], %s2234_s2  ;;  %p1594_p0 = scmp.ne.s32.totalorder %s2004_s21, %s1593_s4 }
  0x95   : > { %s1598_s10 = scalar_lea.hbm %s2203_s1, 256  ;;  %p1599_p6 = scmp.lt.u32.totalorder %s2004_s21, %s2203_s1 }
  0x96   : > { %p1596_p8 = pnand %p1594_p0, %p1565_p9  ;;  %p1600_p10 = scmp.lt.u32.totalorder %s1598_s10, %s1593_s4 }
  0x97   : > { %p1602_p7 = scmp.lt.u32.totalorder %s1593_s4, %s2004_s21 }
  0x98   : > { %p1597_p13 = pneg %p1596_p8  ;;  %p1601_p3 = por %p1600_p10, %p1599_p6 }
  0x9a   : > { %p1603_p12 = por %p1602_p7, %p1601_p3 }
  0x9c   : > { %p1604_p1 = pnand %p1603_p12, %p1597_p13 }
  0x9e   : > { %1607 = shalt.err (!%p1604_p1)
}
  0x9f   : > { %s1608_s2 = scalar_lea.vmem %s312_s0, 128  ;;  %s1741_s13 = smov [#allocation8]  }
  0xa0   : > { %p1609_p2 = scmp.ne.s32.totalorder %s312_s0, %s1608_s2  ;;  %s1613_s23 = sshll.u32 %s1741_s13, 4  ;;  %s1614_s23 = int_to_ptr.vmem [resolvable:$false] %s1613_s23 }
  0xa1   : > { %s1615_s11 = scalar_lea.vmem %s1614_s23, 256  ;;  %p1616_p8 = scmp.lt.s32.totalorder %s312_s0, %s1614_s23 }
  0xa2   : > { %p1611_p4 = pnand %p1609_p2, %p1565_p9  ;;  %p1617_p5 = scmp.lt.s32.totalorder %s1615_s11, %s1608_s2 }
  0xa4   : > { %p1612_p0 = pneg %p1611_p4  ;;  %p1618_p6 = por %p1617_p5, %p1616_p8 }
  0xa6   : > { %p1619_p10 = pnand %p1618_p6, %p1612_p0 }
  0xa8   : > { %1622 = shalt.err (!%p1619_p10)
}
  0xa9   : > { %1394 = dma.hbm_to_vmem [thread:$0]  (!%p1961_p11), %s2004_s21, 128, %s312_s0, %s301_s3  }
  0xaa   : > { %p2235_p13 = scmp.ne.s32.totalorder %s2223_s9, 0 }
  0xab   : > { %s2030_s4 = sand.u32 (!%p2235_p13), 1, %s1725_s25   ;;  %p2236_p5 = scmp.ne.s32.totalorder (!%p2235_p13), %s2220_s30, 0 }
  0xac   : > { %320 = sbr.rel (%p2235_p13) target bundleno = 2054 (0x806), region = 44  ;;  %s1205_s12 = sshll.u32 (!%p2235_p13), %s2030_s4, 4 }
  0xad   : > { %s323_s16 = scalar_lea.sflag (!%p2235_p13), [#allocation6], %s2030_s4  ;;  %s2036_s29 = scalar_lea.vmem (!%p2235_p13), [#allocation5], %s1205_s12 }
  0xb3   : > { %1696 = dma.done.wait (%p2236_p5), %s323_s16, 256  }
  0xb4   : > { %1698 = vsyncadd (%p2236_p5), %s323_s16, 4294967040  ;;  %s331_s0 = sand.u32 1, %s1814_s28   ;;  %s1206_s3 = sshll.u32 %s2030_s4, 3 }
  0xb5   : > { %s332_s9 = scalar_lea.sflag [#allocation9], %s331_s0  ;;  %s2046_s8 = scalar_lea.vmem [#allocation8], %s1206_s3 }
  0xb6   : > { %1700 = dma.done.wait (%p2236_p5), %s332_s9, 128  }
  0xb7   : > { %1702 = vsyncadd (%p2236_p5), %s332_s9, 4294967168  ;;  %p2237_p11 = scmp.eq.s32.totalorder %s1814_s28, 0 }
  0xb9   : > { %1704 = dma.done.wait (%p2237_p11), [#allocation9], 512   ;;  %p2238_p9 = pmov %p2237_p11 }
  0xbb   : > { %1706 = vsyncadd (%p2238_p9), [#allocation9], 4294966784  ;;  %p2239_p3 = pmov %p2238_p9 }
  0xbd   : > { %1708 = dma.done.wait (%p2239_p3), [#allocation12], 1024   ;;  %p2240_p7 = pmov %p2239_p3 }
  0xbe   : > { %v1742_v0 = vmov 0.0|0.0   ;;  %vm1743_vm0 = vmmov 0   ;;  %v1744_v1 = vmov 0.0   ;;  %vm393_vm1 = vcmask 261120   ;;  %v470_v2 = vld [vmem:[#allocation11] sm:$0xff]  ;;  %v471_v3 = vld [vmem:[#allocation11 + $0x8] sm:$0xff] }
  0xbf   : > { %1710 = vsyncadd (%p2240_p7), [#allocation12], 4294966272  ;;  %1324 = vmatprep.subr.bf16.mxu0 %v1742_v0  ;;  %1271 = vmatprep.mubr.msk.f32.mxu0 %vm1743_vm0, %v1744_v1  ;;  %v472_v4 = vld [vmem:[#allocation11 + $0x10] sm:$0xff]  ;;  %v1330_v5 = vpack.c.bf16 %v471_v3, %v470_v2  ;;  %v473_v6 = vld [vmem:[#allocation11 + $0x18] sm:$0xff]  ;;  %vm555_vm2 = vcmask 523264   ;;  %vm561_vm3 = vcmask 130048  }
  0xc0   : > { %v468_v7 = vld [vmem:[%s2036_s29] sm:$0xff]  ;;  %v1334_v8 = vpack.c.bf16 %v473_v6, %v472_v4  ;;  %v390_v10 = vld [vmem:[#allocation10 + $0x8] sm:$0xff]  ;;  %v392_v13 = vld [vmem:[#allocation10 + $0x18] sm:$0xff]  ;;  %s1745_s30 = smov 96   ;;  %s1746_s21 = smov 112   ;;  %vm917_vm5 = vcmask 261248  }
  0xc1   : > { %1282 = vmatprep.mubr.msk.f32.mxu1 %vm393_vm1, %v468_v7  ;;  %v389_v9 = vld [vmem:[#allocation10] sm:$0xff]  ;;  %v391_v11 = vld [vmem:[#allocation10 + $0x10] sm:$0xff]  ;;  %1331 = vmatprep.subr.bf16.mxu1 %v1330_v5  ;;  %v469_v15 = vld [vmem:[%s2036_s29 + $0x8] sm:$0xff]  ;;  %s2095_s15 = scalar_lea.vmem [#allocation15], %s1205_s12  ;;  %s1747_s20 = smov 80  }
  0xc2   : > { %v1325_v12 = vpack.c.bf16 %v390_v10, %v389_v9  ;;  %1333 = vmatpush3.bf16.msra.mxu1 %v1330_v5  ;;  %v1328_v14 = vpack.c.bf16 %v392_v13, %v391_v11  ;;  %v388_v16 = vld [vmem:[%s2046_s8] sm:$0xff]  ;;  %vm2079_vm4 = vmpackc.low %vm561_vm3, %vm561_vm3  ;;  %v921_v2 = vld [vmem:[#allocation13 + $0x8] sm:$0xff]  ;;  %s1748_s10 = smov 16   ;;  %s1234_s14 = sshll.u32 %s1814_s28, 8 }
  0xc3   : > { %1335 = vmatprep.subr.bf16.mxu1 %v1334_v8  ;;  %v922_v4 = vld [vmem:[#allocation13 + $0x10] sm:$0xff]  ;;  %v923_v5 = vld [vmem:[#allocation13 + $0x18] sm:$0xff]  ;;  %s1037_s17 = sshll.u32 %s2095_s15, 4  ;;  %s2120_s23 = scalar_lea.hbm %s2209_s7, %s1234_s14  ;;  %s2122_s17 = int_to_ptr.vmem [resolvable:$true] %s1037_s17 }
  0xc4   : > { %1326 = vmatpush3.bf16.msra.mxu0 %v1325_v12  ;;  %v1356_v6 = vpack.c.bf16 %v923_v5, %v922_v4  ;;  %s1011_s11 = scalar_lea.sflag [#allocation16], %s2030_s4  ;;  %s1623_s12 = scalar_lea.vmem %s2122_s17, 256 }
  0xc5   : > { %1327 = vmatprep.subr.bf16.mxu0 %v1742_v0  ;;  %p1624_p12 = scmp.ne.s32.totalorder %s2122_s17, %s1623_s12  ;;  %p2243_p1 = scmp.ne.s32.totalorder %s2230_s19, 0 }
  0xc6   : > { %1337 = vmatpush3.bf16.msra.mxu1 %v1334_v8  ;;  %s1749_s16 = smov [#allocation15]  }
  0xc7   : > { %1342 = vmatprep.subr.bf16.mxu1 %v1742_v0  ;;  %p1625_p2 = pnand %p1624_p12, %p2243_p1  ;;  %s1627_s29 = sshll.u32 %s1749_s16, 4  ;;  %s1628_s29 = int_to_ptr.vmem [resolvable:$false] %s1627_s29 }
  0xc8   : > { %1329 = vmatpush3.bf16.msra.mxu0 %v1328_v14  ;;  %s1629_s0 = scalar_lea.vmem %s1628_s29, 512  ;;  %p1630_p0 = scmp.lt.s32.totalorder %s2122_s17, %s1628_s29 }
  0xc9   : > { %1338 = vmatprep.subr.bf16.mxu0 %v1742_v0  ;;  %1283 = vmatmul.mubr.msk.f32.vlgmr.msra.gmra.mrb[0].mxu1 %vm393_vm1, %v469_v15  ;;  %p1626_p4 = pneg %p1625_p2  ;;  %p1631_p8 = scmp.lt.s32.totalorder %s1629_s0, %s1623_s12 }
  0xca   : > { %1296 = vmatprep.mubr.msk.f32.mxu1 %vm1743_vm0, %v1744_v1 }
  0xcb   : > { %1272 = vmatmul.mubr.msk.f32.vlgmr.msra.gmra.mrb[0].mxu0 %vm393_vm1, %v388_v16  ;;  %p1632_p6 = por %p1631_p8, %p1630_p0 }
  0xcc   : > { %1289 = vmatprep.mubr.msk.f32.mxu0 %vm1743_vm0, %v1744_v1 }
  0xcd   : > { %p1633_p10 = pnand %p1632_p6, %p1626_p4 }
 0x19c   : > { %v1284_v17 = vpop.f32.mrb[0].mxu1 }
 0x19d   : > { %557 = vst.msk [vmem:[#allocation3 + $0x8] sm:$0xff] %vm555_vm2, %v1284_v17  ;;  %v546_v18 = vpop.f32.mrb[1].mxu1 }
 0x19e   : > { %v463_v19 = vpop.f32.mrb[0].mxu0  ;;  %556 = vst.msk [vmem:[#allocation3] sm:$0xff] %vm555_vm2, %v546_v18 }
 0x19f   : > { %467 = vst.msk [vmem:[#allocation2] sm:$0xff] %vm393_vm1, %v463_v19  ;;  %v1273_v20 = vpop.f32.mrb[1].mxu0 }
 0x1a4   : > { %v560_v21 = vld [vmem:[#allocation3 + $0x8] sm:$0xff] }
 0x1a5   : > { %v559_v22 = vld [vmem:[#allocation3] sm:$0xff] }
 0x1a6   : > { %v1456_v24 = vpack.i.bf16 %v560_v21, %v559_v22  ;;  %v1339_v25 = vpack.c.bf16 %v560_v21, %v559_v22  ;;  %v558_v26 = vld [vmem:[#allocation2] sm:$0xff] }
 0x1a8   : > { %1457 = vrot.lane.b32.xlu1 %v1456_v24, %s1745_s30  ;;  %1341 = vmatpush3.bf16.xpose.msk.msra.mxu0 %vm2079_vm4, %v1339_v25 }
 0x1a9   : > { %1352 = vmatprep.subr.bf16.mxu0 %v1742_v0 }
 0x1ac   : > { %1462 = vrot.lane.b32.xlu1 %v1456_v24, %s1746_s21 }
 0x1af   : > { %1290 = vmatmul.mubr.msk.f32.vlgmr.msra.gmra.mrb[2].mxu0 %vm561_vm3, %v558_v26 }
 0x1b0   : > { %1321 = vmatprep.mubr.msk.f32.mxu0 %vm1743_vm0, %v1744_v1 }
 0x21a   : > { %v1458_v27 = vpop.permute.xlu1 %1457 }
 0x21b   : > { %v1460_v28 = vunpack.i.h.bf16 %v1458_v27  ;;  %v1459_v29 = vunpack.i.l.bf16 %v1458_v27 }
 0x21d   : > { %v1343_v30 = vpack.c.bf16 %v1460_v28, %v1459_v29 }
 0x21e   : > { %v1463_v40 = vpop.permute.xlu1 %1462 }
 0x21f   : > { %1344 = vmatpush3.bf16.msra.mxu1 %v1343_v30  ;;  %v1465_v41 = vunpack.i.h.bf16 %v1463_v40  ;;  %v1464_v42 = vunpack.i.l.bf16 %v1463_v40 }
 0x220   : > { %1345 = vmatprep.subr.bf16.mxu1 %v1742_v0 }
 0x221   : > { %v1346_v45 = vpack.c.bf16 %v1465_v41, %v1464_v42 }
 0x282   : > { %v637_v31 = vpop.f32.mrb[2].mxu0 }
 0x283   : > { %v1291_v32 = vpop.f32.mrb[3].mxu0  ;;  %v641_v33 = vsel %vm561_vm3, %v637_v31, -inf }
 0x284   : > { %642 = vmax.xlane.f32.xlu0 %v641_v33 }
 0x311   : > { %v643_v34 = vpop.xlane.xlu0 %642 }
 0x312   : > { %v644_v35 = vsub.f32 %v637_v31, %v643_v34 }
 0x314   : > { %v645_v36 = vmul.f32 1.442695, %v644_v35 }
 0x316   : > { %1471 = vpow2.f32 %v645_v36 }
 0x320   : > { %v1472_v37 = vpop.eup %1471 }
 0x321   : > { %v647_v38 = vsel %vm561_vm3, %v1472_v37, 0.0 }
 0x322   : > { %648 = vadd.xlane.f32.xlu0 %v647_v38 }
 0x338   : > { %737 = vrot.lane.b32.xlu0 %v558_v26, %s1746_s21 }
 0x3af   : > { %v649_v39 = vpop.xlane.xlu0 %648 }
 0x3b0   : > { %1473 = vrcp.f32 %v649_v39 }
 0x3b3   : > { %v738_v46 = vpop.permute.xlu0 %737 }
 0x3ba   : > { %v1474_v43 = vpop.eup %1473 }
 0x3bb   : > { %v651_v44 = vmul.f32 %v1474_v43, %v1472_v37 }
 0x3bd   : > { %1297 = vmatmul.mubr.msk.f32.vlgmr.msra.gmra.mrb[2].mxu1 %vm561_vm3, %v651_v44  ;;  %652 = vst.msk [vmem:[%s2095_s15] sm:$0xff] %vm561_vm3, %v651_v44 }
 0x3be   : > { %1348 = vmatpush3.bf16.xpose.msk.msra.mxu1 %vm2079_vm4, %v1346_v45  ;;  %1303 = vmatprep.mubr.msk.f32.mxu1 %vm1743_vm0, %v1744_v1 }
 0x3bf   : > { %1349 = vmatprep.subr.bf16.mxu1 %v1742_v0 }
 0x3c5   : > { %1304 = vmatmul.mubr.msk.f32.vlgmr.msra.gmra.mrb[4].mxu1 %vm561_vm3, %v738_v46 }
 0x3c6   : > { %1310 = vmatprep.mubr.msk.f32.mxu1 %vm1743_vm0, %v1744_v1  ;;  %v920_v1 = vld [vmem:[#allocation13] sm:$0xff] }
 0x3c7   : > { %v1353_v3 = vpack.c.bf16 %v921_v2, %v920_v1 }
 0x3c9   : > { %1354 = vmatpush3.bf16.msra.mxu0 %v1353_v3 }
 0x3ca   : > { %1355 = vmatprep.subr.bf16.mxu0 %v1742_v0 }
 0x3cd   : > { %1357 = vmatpush3.bf16.msra.mxu0 %v1356_v6 }
 0x490   : > { %v728_v47 = vpop.f32.mrb[2].mxu1 }
 0x491   : > { %732 = vst.msk [vmem:[#allocation4] sm:$0xff] %vm561_vm3, %v728_v47  ;;  %v1298_v48 = vpop.f32.mrb[3].mxu1 }
 0x498   : > { %v817_v49 = vpop.f32.mrb[4].mxu1 }
 0x499   : > { %v1305_v50 = vpop.f32.mrb[5].mxu1  ;;  %v821_v51 = vsel %vm561_vm3, %v817_v49, -inf }
 0x49a   : > { %822 = vmax.xlane.f32.xlu1 %v821_v51 }
 0x4ab   : > { %1467 = vrot.lane.b32.xlu1 %v1456_v24, %s1747_s20 }
 0x527   : > { %v823_v52 = vpop.xlane.xlu1 %822 }
 0x528   : > { %v824_v53 = vsub.f32 %v817_v49, %v823_v52 }
 0x52a   : > { %v825_v54 = vmul.f32 1.442695, %v824_v53 }
 0x52b   : > { %v1468_v55 = vpop.permute.xlu1 %1467 }
 0x52c   : > { %1475 = vpow2.f32 %v825_v54  ;;  %v1470_v56 = vunpack.i.h.bf16 %v1468_v55  ;;  %v1469_v57 = vunpack.i.l.bf16 %v1468_v55 }
 0x52e   : > { %v1350_v58 = vpack.c.bf16 %v1470_v56, %v1469_v57 }
 0x530   : > { %1351 = vmatpush3.bf16.msra.mxu1 %v1350_v58 }
 0x536   : > { %v1476_v59 = vpop.eup %1475 }
 0x537   : > { %v827_v60 = vsel %vm561_vm3, %v1476_v59, 0.0 }
 0x538   : > { %828 = vadd.xlane.f32.xlu0 %v827_v60 }
 0x5c5   : > { %v829_v61 = vpop.xlane.xlu0 %828 }
 0x5c6   : > { %1477 = vrcp.f32 %v829_v61 }
 0x5d0   : > { %v1478_v62 = vpop.eup %1477 }
 0x5d1   : > { %v831_v63 = vmul.f32 %v1478_v62, %v1476_v59 }
 0x5d3   : > { %1311 = vmatmul.mubr.msk.f32.vlgmr.msra.gmra.mrb[6].mxu1 %vm561_vm3, %v831_v63  ;;  %1222 = vst.msk [vmem:[%s2095_s15 + $0x8] sm:$0xff] %vm561_vm3, %v831_v63 }
 0x6a6   : > { %v909_v7 = vpop.f32.mrb[6].mxu1 }
 0x6a7   : > { %914 = vrot.lane.b32.xlu0 %v909_v7, %s1748_s10  ;;  %v1312_v8 = vpop.f32.mrb[7].mxu1 }
 0x719   : > { %v915_v9 = vpop.permute.xlu0 %914 }
 0x71a   : > { %918 = vst.msk [vmem:[#allocation4] sm:$0xff] %vm917_vm5, %v915_v9 }
 0x721   : > { %v919_v10 = vld [vmem:[#allocation4] sm:$0xff] }
 0x722   : > { %1322 = vmatmul.mubr.msk.f32.vlgmr.msra.gmra.mrb[4].mxu0 %vm393_vm1, %v919_v10 }
 0x723   : > { %1636 = shalt.err (!%p1633_p10)
}
 0x724   : > { %s1637_s9 = scalar_lea.hbm %s2120_s23, 256  ;;  %s1641_s21 = scalar_lea.hbm %s2209_s7, 512 }
 0x725   : > { %p1638_p13 = scmp.ne.s32.totalorder %s2120_s23, %s1637_s9  ;;  %p1642_p9 = scmp.lt.u32.totalorder %s2120_s23, %s2209_s7 }
 0x726   : > { %p1643_p3 = scmp.lt.u32.totalorder %s1641_s21, %s1637_s9  ;;  %p1645_p12 = scmp.lt.u32.totalorder %s1637_s9, %s2120_s23 }
 0x727   : > { %p1639_p5 = pnand %p1638_p13, %p2243_p1 }
 0x728   : > { %p1644_p7 = por %p1643_p3, %p1642_p9 }
 0x729   : > { %p1640_p11 = pneg %p1639_p5 }
 0x72a   : > { %p1646_p2 = por %p1645_p12, %p1644_p7 }
 0x72c   : > { %p1647_p4 = pnand %p1646_p2, %p1640_p11 }
 0x72e   : > { %1650 = shalt.err (!%p1647_p4)
}
 0x72f   : > { %s1750_s10 = smov 128   ;;  %s1751_s14 = smov 8   ;;  %v1224_v0 = vld [vmem:[%s2207_s5] ss:$0 sm:$0xff] }
 0x730   : > { %1375 = dma.vmem_to_hbm [thread:$0]  (%p2243_p1), %s2122_s17, 256, %s2120_s23, %s1011_s11, %s1750_s10, %s1750_s10, %s1751_s14  }
 0x731   : > { %s1228_s12 = sshll.u32 %s1814_s28, 7  ;;  %s380_s16 = scalar_lea.vmem [#allocation14], %s1206_s3 }
 0x732   : > { %s1024_s29 = sshll.u32 %s380_s16, 4  ;;  %s2157_s8 = scalar_lea.hbm %s2208_s6, %s1228_s12  ;;  %s2159_s29 = int_to_ptr.vmem [resolvable:$true] %s1024_s29 }
 0x733   : > { %s1006_s17 = scalar_lea.sflag [#allocation7], %s2030_s4  ;;  %s1651_s28 = scalar_lea.vmem %s2159_s29, 128 }
 0x734   : > { %p1652_p0 = scmp.ne.s32.totalorder %s2159_s29, %s1651_s28  ;;  %s1752_s3 = smov [#allocation14]  }
 0x735   : > { %s1655_s23 = sshll.u32 %s1752_s3, 4  ;;  %s1656_s23 = int_to_ptr.vmem [resolvable:$false] %s1655_s23 }
 0x736   : > { %p1653_p8 = pnand %p1652_p0, %p2243_p1  ;;  %s1657_s11 = scalar_lea.vmem %s1656_s23, 256 }
 0x737   : > { %p1658_p10 = scmp.lt.s32.totalorder %s2159_s29, %s1656_s23  ;;  %p1659_p13 = scmp.lt.s32.totalorder %s1657_s11, %s1651_s28 }
 0x738   : > { %p1654_p6 = pneg %p1653_p8 }
 0x739   : > { %p1660_p5 = por %p1659_p13, %p1658_p10 }
 0x73b   : > { %p1661_p11 = pnand %p1660_p5, %p1654_p6 }
 0x7f5   : > { %v1000_v11 = vpop.f32.mrb[4].mxu0 }
 0x7f6   : > { %v1001_v12 = vadd.f32 %v1224_v0, %v1000_v11  ;;  %v1323_v13 = vpop.f32.mrb[5].mxu0 }
 0x7f8   : > { %1004 = vst.msk [vmem:[%s380_s16] sm:$0xff] %vm393_vm1, %v1001_v12 }
 0x7f9   : > { %1664 = shalt.err (!%p1661_p11)
}
 0x7fa   : > { %s1665_s4 = scalar_lea.hbm %s2157_s8, 128  ;;  %s1669_s15 = scalar_lea.hbm %s2208_s6, 256 }
 0x7fb   : > { %p1666_p9 = scmp.ne.s32.totalorder %s2157_s8, %s1665_s4  ;;  %p1670_p12 = scmp.lt.u32.totalorder %s2157_s8, %s2208_s6 }
 0x7fc   : > { %p1671_p2 = scmp.lt.u32.totalorder %s1669_s15, %s1665_s4  ;;  %p1673_p0 = scmp.lt.u32.totalorder %s1665_s4, %s2157_s8 }
 0x7fd   : > { %p1667_p3 = pnand %p1666_p9, %p2243_p1 }
 0x7fe   : > { %p1672_p4 = por %p1671_p2, %p1670_p12 }
 0x7ff   : > { %p1668_p7 = pneg %p1667_p3 }
 0x800   : > { %p1674_p8 = por %p1673_p0, %p1672_p4 }
 0x802   : > { %p1675_p6 = pnand %p1674_p8, %p1668_p7 }
 0x804   : > { %1678 = shalt.err (!%p1675_p6)
}
 0x805   : > { %1374 = dma.vmem_to_hbm [thread:$0]  (%p2243_p1), %s2159_s29, 128, %s2157_s8, %s1006_s17  }
 0x806 PF: > { %s2244_s14 = sld [smem:[#allocation23_spill]]  ;;  %s1052_s2 = sand.u32 1, %s1721_s24  }
 0x807   : > { %p2246_p13 = scmp.ge.s32.totalorder %s1733_s27, 2  ;;  %s1053_s13 = scalar_lea.sflag [#allocation7], %s1052_s2 }
 0x80c   : > { %p2245_p10 = scmp.ne.s32.totalorder %s2244_s14, 0 }
 0x80e   : > { %p1396_p5 = pnand %p2246_p13, %p2245_p10 }
 0x810   : > { %1712 = dma.done.wait (!%p1396_p5), %s1053_s13, 128  }
 0x811   : > { %1714 = vsyncadd (!%p1396_p5), %s1053_s13, 4294967168  ;;  %s1062_s12 = scalar_lea.sflag [#allocation16], %s1052_s2 }
 0x812   : > { %1716 = dma.done.wait (!%p1396_p5), %s1062_s12, 256  }
 0x813   : > { %1718 = vsyncadd (!%p1396_p5), %s1062_s12, 4294967040  ;;  %p28_p1 = scmp.ge.s32.totalorder %s1933_s22, 4   ;;  %s2247_s24 = smov %s1725_s25 }
 0x814   : > { %s2248_s25 = smov %s1729_s26  ;;  %s2249_s26 = smov %s1943_s18 }
 0x815   : > { %s2250_s27 = smov %s1933_s22  ;;  %30 = sbr.rel (!%p28_p1) target bundleno = 15 (0xf), region = 132 }
 0x81c   :  { %1067 = vsyncpa [#allocation6], 1 }
 0x81d   :  { %1069 = vsyncpa [#allocation6 + $0x1], 1 }
 0x81e   :  { %1070 = vsyncpa [#allocation9], 1 }
 0x81f   :  { %1072 = vsyncpa [#allocation9 + $0x1], 1 }
 0x820   :  { %1073 = vsyncpa [#allocation12], 1 }
 0x821   :  { %1074 = vsyncpa [#allocation7], 1 }
 0x822   :  { %1076 = vsyncpa [#allocation7 + $0x1], 1 }
 0x823   :  { %1077 = vsyncpa [#allocation16], 1 }
 0x824   :  { %1079 = vsyncpa [#allocation16 + $0x1], 1 }

</bundles_post_ra>
